<compile_context>
chip_gen: v5e
topology: v5e:2x2
jax: 0.10.0
libtpu: 0.0.40
codegen_flags: <defaults>
</compile_context>

<pallas_src>
import functools

import jax
import jax.numpy as jnp
from jax.experimental import pallas as pl
from jax.experimental.pallas import tpu as pltpu


def _window_mul_kernel(k_ref, x_ref, o_ref):
    # k_ref: (1, TL) f32 window slab (row-resident); x_ref / o_ref: (TB, TL).
    # Compute in f32 to match torch.mul promotion (the window is float32).
    o_ref[...] = (x_ref[...].astype(jnp.float32) * k_ref[...]).astype(o_ref.dtype)


@functools.lru_cache(maxsize=1)
def _vmem_capacity_bytes() -> int:
    try:
        return int(pltpu.get_tpu_info().vmem_capacity_bytes)
    except Exception:
        return 64 << 20  # conservative fallback (v7x physical VMEM per TC)


def _sublane_multiple(dtype) -> int:
    # 8 rows for 32-bit, 16 for bf16/f16, 32 for int8/fp8 (packed sublane tile).
    bits = jnp.dtype(dtype).itemsize * 8
    return max(8, 256 // max(bits, 1))


def _plan_tiling(rows: int, L: int, in_itemsize: int, out_itemsize: int,
                 mult: int):
    """Pick (tb, tl, vmem_limit_bytes) from a footprint-derived VMEM budget."""
    cap = _vmem_capacity_bytes()
    usable = max(cap - (16 << 20), 8 << 20)      # ~48 MiB on v7x, ~112 MiB v5e/v6e
    headroom = 4 << 20
    win_bytes = 2 * L * 4                        # window block, double-buffered
    per_elem = 2 * (in_itemsize + out_itemsize)  # double-buffered in + out blocks
    budget_elems = max((usable - headroom - win_bytes) // per_elem, mult * 128)

    # ~8 MiB input blocks amortize the ~0.35 us per-grid-step overhead.
    target_elems = (8 << 20) // max(in_itemsize, 1)
    block_elems = min(budget_elems, target_elems)

    # Lane split only when even a minimal (mult-row) block would overflow the
    # budget and L is 128-aligned (ragged lane-edge blocks need tl % 128 == 0).
    if L % 128 == 0 and mult * L > block_elems:
        tl = min(L, max(128, (block_elems // mult) // 128 * 128))
    else:
        tl = L
        # TODO(synk): a huge non-128-multiple L with very few rows could still
        # exceed the VMEM budget; would need an Element-indexed spatial split.

    tb_cap = max(block_elems // tl, 1)
    if tb_cap >= rows:
        tb = rows                                 # full-extent block is always legal
    else:
        tb = min(rows, max(mult, (tb_cap // mult) * mult))

    footprint = 2 * tb * tl * (in_itemsize + out_itemsize) + win_bytes + headroom
    vmem_limit = int(min(max(footprint, 32 << 20), usable))
    return tb, tl, vmem_limit


@functools.partial(jax.jit, static_argnames=("top", "bottom", "left", "right"))
def hann_kernel_forward(x, wi, wj, top=False, bottom=False, left=False, right=False):
    """x: (N, C, S, S); wi, wj: (S,) float windows. Matches Kernel.forward."""
    si = wi.shape[0]
    sj = wj.shape[0]

    # --- get_kernel() edge-flattening semantics (static python bools) ---
    if top:
        wi = wi.at[: si // 2].set(1.0)
    if bottom:
        wi = wi.at[si // 2:].set(1.0)
    if left:
        wj = wj.at[: sj // 2].set(1.0)
    if right:
        wj = wj.at[sj // 2:].set(1.0)

    # Precompute the 2-D window once; keep it f32 and lane-dense (1, S*S).
    k2d = wi.astype(jnp.float32)[:, None] * wj.astype(jnp.float32)[None, :]

    n, c, h, w = x.shape
    assert h == si and w == sj, "spatial dims must match window lengths"

    rows = n * c
    L = h * w
    xf = x.reshape(rows, L)
    kf = k2d.reshape(1, L)

    # torch.mul promotion: f32 kernel promotes half/bf16 inputs to f32.
    out_dtype = jnp.promote_types(x.dtype, jnp.float32)
    in_itemsize = jnp.dtype(x.dtype).itemsize
    out_itemsize = jnp.dtype(out_dtype).itemsize
    mult = max(_sublane_multiple(x.dtype), _sublane_multiple(out_dtype))

    tb, tl, vmem_limit = _plan_tiling(rows, L, in_itemsize, out_itemsize, mult)
    grid = (pl.cdiv(rows, tb), pl.cdiv(L, tl))

    out = pl.pallas_call(
        _window_mul_kernel,
        out_shape=jax.ShapeDtypeStruct((rows, L), out_dtype),
        grid=grid,
        in_specs=[
            pl.BlockSpec((1, tl), lambda i, j: (0, j)),    # window: row-resident
            pl.BlockSpec((tb, tl), lambda i, j: (i, j)),   # x block (lane-dense)
        ],
        out_specs=pl.BlockSpec((tb, tl), lambda i, j: (i, j)),
        compiler_params=pltpu.CompilerParams(
            dimension_semantics=("parallel", "parallel"),
            vmem_limit_bytes=vmem_limit,
        ),
    )(kf, xf)

    return out.reshape(n, c, h, w)


def make_hann_window(size: int) -> jnp.ndarray:
    # kelp_o_matic HannKernel._init_wi: (1 - cos(2*pi*i/(size-1))) / 2 (symmetric).
    if size < 2:
        return jnp.ones((size,), dtype=jnp.float32)
    i = jnp.arange(size, dtype=jnp.float32)
    return 0.5 * (1.0 - jnp.cos(2.0 * jnp.pi * i / (size - 1)))


if __name__ == "__main__":
    size = 16
    n, c = 2, 4

    key = jax.random.PRNGKey(0)
    x = jax.random.normal(key, (n, c, size, size), dtype=jnp.float32)

    # deterministic "parameters" (HannKernel init): wj is a clone of wi
    wi = make_hann_window(size)
    wj = wi

    out = hann_kernel_forward(x, wi, wj, top=True, left=False)
    out = jax.block_until_ready(out)

    # pure-JAX reference check
    wi_ref = wi.at[: size // 2].set(1.0)  # top=True
    wj_ref = wj
    kernel_ref = wi_ref[:, None] * wj_ref[None, :]
    expected = x * kernel_ref
    assert out.dtype == expected.dtype
    assert jnp.allclose(out, expected, atol=1e-6, rtol=1e-6), "mismatch vs reference"

    print("KERNEL_OK")
</pallas_src>

<mosaic_0001>
module attributes {stable_mosaic.version = 11 : i64} {
  func.func @_window_mul_kernel(%arg0: i32, %arg1: i32, %arg2: memref<1x256xf32, #tpu.memory_space<vmem>>, %arg3: memref<8x256xf32, #tpu.memory_space<vmem>>, %arg4: memref<8x256xf32, #tpu.memory_space<vmem>>) attributes {dimension_semantics = [#tpu.dimension_semantics<parallel>, #tpu.dimension_semantics<parallel>], iteration_bounds = array<i64: 1, 1>, scalar_prefetch = 0 : i64, scratch_operands = 0 : i64, tpu.core_type = #tpu.core_type<tc>, window_params = [{transform_indices = @transform_0, window_bounds = array<i64: 1, 256>}, {transform_indices = @transform_1, window_bounds = array<i64: 8, 256>}, {transform_indices = @transform_2, window_bounds = array<i64: 8, 256>}]} {
    %c0 = arith.constant 0 : index
    %c0_0 = arith.constant 0 : index
    %0 = vector.load %arg3[%c0, %c0_0] : memref<8x256xf32, #tpu.memory_space<vmem>>, vector<8x256xf32>
    %c0_1 = arith.constant 0 : index
    %c0_2 = arith.constant 0 : index
    %1 = vector.load %arg2[%c0_1, %c0_2] : memref<1x256xf32, #tpu.memory_space<vmem>>, vector<1x256xf32>
    %2 = vector.broadcast %1 : vector<1x256xf32> to vector<8x256xf32>
    %3 = arith.mulf %0, %2 : vector<8x256xf32>
    %c0_3 = arith.constant 0 : index
    %c0_4 = arith.constant 0 : index
    %4 = vector.load %arg4[%c0_3, %c0_4] : memref<8x256xf32, #tpu.memory_space<vmem>>, vector<8x256xf32>
    tpu.vector_store %arg4[%c0_3, %c0_4], %3 {strides = array<i32>} : memref<8x256xf32, #tpu.memory_space<vmem>>, vector<8x256xf32>,
    return
  }
  func.func @transform_0(%arg0: i32, %arg1: i32) -> (i32, i32) {
    %c0_i32 = arith.constant 0 : i32
    %c0_i32_0 = arith.constant 0 : i32
    return %c0_i32, %arg1 : i32, i32
  }
  func.func @transform_1(%arg0: i32, %arg1: i32) -> (i32, i32) {
    %c0_i32 = arith.constant 0 : i32
    return %arg0, %arg1 : i32, i32
  }
  func.func @transform_2(%arg0: i32, %arg1: i32) -> (i32, i32) {
    %c0_i32 = arith.constant 0 : i32
    return %arg0, %arg1 : i32, i32
  }
}

</mosaic_0001>

<bundles_post_ra>
// kernel: hann_kernel_forward.1
= control target key start
LH: loop header
LB: loop body
LE: loop exit
PB: predicated region body
PF: predicated region fallthrough
CT: control target
= control target key end

     0   :  { %s57_s0 = inlined_call_operand.vmem [shape: f32[1,256], index: 0, kind: input, shape index: {}]   ;;  %s58_s1 = inlined_call_operand.vmem [shape: f32[8,256], index: 1, kind: input, shape index: {}]   ;;  %s59_s2 = inlined_call_operand.vmem [shape: f32[8,256], index: 2, kind: output, shape index: {}]  }
   0x1   :  { %v11_v0 = vld [vmem:[%s58_s1] sm:$0xff]  ;;  %v12_v2 = vld [vmem:[%s58_s1 + $0x8] sm:$0xff] }
   0x2   :  { %v13_v1 = vld [vmem:[%s57_s0] sm:$0x3] }
   0x3   :  { %v15_v3 = vperm.slane %v13_v1, 0  ;;  %v16_v4 = vperm.slane %v13_v1, 1 }
   0x5   :  { %v19_v5 = vmul.f32 %v15_v3, %v11_v0  ;;  %v20_v6 = vmul.f32 %v16_v4, %v12_v2 }
   0x7   :  { %21 = vst [vmem:[%s59_s2] sm:$0xff] %v19_v5 }
   0x8   :  { %22 = vst [vmem:[%s59_s2 + $0x8] sm:$0xff] %v20_v6 }

</bundles_post_ra>
